<compile_context>
chip_gen: v7x
topology: tpu7x:2x2x1
jax: 0.10.0
libtpu: 0.0.40
codegen_flags: <defaults>
</compile_context>

<pallas_src>
import math
import functools

import jax
import jax.numpy as jnp
from jax.experimental import pallas as pl
from jax.experimental.pallas import tpu as pltpu


def make_pe_table(max_len, d_model, dtype=jnp.float32):
    """Deterministic sin/cos positional-encoding buffer, shape (max_len, 1, d_model)."""
    position = jnp.arange(max_len, dtype=jnp.float32)[:, None]                 # (L, 1)
    div_term = jnp.exp(jnp.arange(0, d_model, 2, dtype=jnp.float32)
                       * (-math.log(10000.0) / d_model))                       # (D/2,)
    pe = jnp.zeros((max_len, d_model), dtype=jnp.float32)
    pe = pe.at[:, 0::2].set(jnp.sin(position * div_term))
    pe = pe.at[:, 1::2].set(jnp.cos(position * div_term))
    return pe[:, None, :].astype(dtype)                                        # (L, 1, D)


def _add_pe_kernel(x_ref, pe_ref, o_ref):
    # Broadcast add: pe block is (tS, 1, D) against x block (tS, B, D), or the
    # same 2-D shape in the lane-dense collapsed layout.
    o_ref[...] = (x_ref[...] + pe_ref[...]).astype(o_ref.dtype)


def _add_pe_dropout_kernel(x_ref, pe_ref, bits_ref, o_ref, *, threshold, scale):
    y = x_ref[...] + pe_ref[...]
    # Inverted dropout: drop with prob p.  P(bits < threshold) = p, so compare
    # the raw uint32 bits against a uint32 threshold (no shift / int->float
    # convert) and fold the 1/(1-p) scale into the select.
    keep = bits_ref[...] >= jnp.uint32(threshold)
    w = jnp.where(keep, jnp.asarray(scale, y.dtype), jnp.asarray(0.0, y.dtype))
    o_ref[...] = (y * w).astype(o_ref.dtype)


def _pick_block_rows(n_rows, row_bytes, target_bytes=2 << 20, multiple=8):
    """Rows per block so one block is ~target_bytes (VMEM-safe on v7x too)."""
    t = max(1, target_bytes // max(int(row_bytes), 1))
    if t >= n_rows:
        return n_rows
    t = max(multiple, (t // multiple) * multiple)
    return min(t, n_rows)


def positional_encoding(x, pe_table, *, p=0.1, training=False, rng_key=None):
    """Forward pass of PositionalEncoding: x + pe[:S] followed by dropout.

    x: (seq_len, batch, d_model).  Dropout is identity when training=False.
    """
    S, B, D = x.shape
    itemsize = jnp.dtype(x.dtype).itemsize

    collapse = (D % 128) != 0
    if collapse:
        # Lane-dense layout: fold (B, D) into one trailing axis; tile pe over
        # batch so the kernel is a plain same-shape elementwise add.
        W = B * D
        x_in = x.reshape(S, W)
        pe_in = jnp.tile(pe_table[:, 0, :], (1, B)).astype(x.dtype)   # (max_len, B*D)
        block_x = (None, W)      # filled with tS below
        row_bytes = W * itemsize
        tS = _pick_block_rows(S, row_bytes, multiple=8)
        x_spec = pl.BlockSpec((tS, W), lambda i: (i, 0))
        pe_spec = pl.BlockSpec((tS, W), lambda i: (i, 0))
        out_spec = pl.BlockSpec((tS, W), lambda i: (i, 0))
    else:
        x_in = x
        pe_in = pe_table.astype(x.dtype)                              # (max_len, 1, D)
        row_bytes = B * D * itemsize
        tS = _pick_block_rows(S, row_bytes, multiple=1)
        x_spec = pl.BlockSpec((tS, B, D), lambda i: (i, 0, 0))
        pe_spec = pl.BlockSpec((tS, 1, D), lambda i: (i, 0, 0))
        out_spec = pl.BlockSpec((tS, B, D), lambda i: (i, 0, 0))

    grid = (pl.cdiv(S, tS),)
    out_shape = jax.ShapeDtypeStruct(x_in.shape, x.dtype)
    cparams = pltpu.CompilerParams(dimension_semantics=("parallel",))

    if (not training) or p == 0.0:
        out = pl.pallas_call(
            _add_pe_kernel,
            out_shape=out_shape,
            grid=grid,
            in_specs=[x_spec, pe_spec],
            out_specs=out_spec,
            input_output_aliases={0: 0},
            compiler_params=cparams,
        )(x_in, pe_in)
        return out.reshape(S, B, D)

    if rng_key is None:
        raise ValueError("training-mode dropout requires rng_key")

    bits = jax.random.bits(rng_key, x_in.shape, dtype=jnp.uint32)
    threshold = min(int(round(p * float(1 << 32))), (1 << 32) - 1)
    scale = 1.0 / (1.0 - p)
    kernel = functools.partial(_add_pe_dropout_kernel, threshold=threshold, scale=scale)
    bits_spec = pl.BlockSpec(x_spec.block_shape, x_spec.index_map)

    out = pl.pallas_call(
        kernel,
        out_shape=out_shape,
        grid=grid,
        in_specs=[x_spec, pe_spec, bits_spec],
        out_specs=out_spec,
        input_output_aliases={0: 0},
        compiler_params=cparams,
    )(x_in, pe_in, bits)
    return out.reshape(S, B, D)


if __name__ == "__main__":
    # Small shapes consistent with the module's forward: (seq_len, batch, d_model).
    seq_len, batch, d_model = 8, 2, 32
    max_len = 64
    p = 0.1

    key = jax.random.PRNGKey(0)
    kx, kdrop = jax.random.split(key)
    x = jax.random.normal(kx, (seq_len, batch, d_model), dtype=jnp.float32)
    pe_table = make_pe_table(max_len, d_model)

    ref = x + pe_table[:seq_len]

    # Eval mode (dropout = identity): exact check against the pure-JAX reference.
    out_eval = positional_encoding(x, pe_table, p=p, training=False)
    out_eval = jax.block_until_ready(out_eval)
    assert out_eval.shape == x.shape and out_eval.dtype == x.dtype
    assert jnp.allclose(out_eval, ref, atol=1e-6, rtol=1e-6), "eval-mode mismatch"

    # Training mode: every output element must be either dropped (0) or
    # (x + pe) scaled by 1/(1-p).
    out_train = positional_encoding(x, pe_table, p=p, training=True, rng_key=kdrop)
    out_train = jax.block_until_ready(out_train)
    assert out_train.shape == x.shape and out_train.dtype == x.dtype
    scaled = ref / (1.0 - p)
    ok = jnp.isclose(out_train, scaled, atol=1e-5) | jnp.isclose(out_train, 0.0, atol=1e-7)
    assert bool(jnp.all(ok)), "dropout output values inconsistent"

    print("KERNEL_OK")
</pallas_src>

<mosaic_0001>
module attributes {stable_mosaic.version = 11 : i64} {
  func.func @_add_pe_kernel(%arg0: i32, %arg1: memref<8x64xf32, #tpu.memory_space<vmem>>, %arg2: memref<8x64xf32, #tpu.memory_space<vmem>>, %arg3: memref<8x64xf32, #tpu.memory_space<vmem>>) attributes {dimension_semantics = [#tpu.dimension_semantics<parallel>], iteration_bounds = array<i64: 1>, scalar_prefetch = 0 : i64, scratch_operands = 0 : i64, tpu.core_type = #tpu.core_type<tc>, window_params = [{transform_indices = @transform_0, window_bounds = array<i64: 8, 64>}, {transform_indices = @transform_1, window_bounds = array<i64: 8, 64>}, {transform_indices = @transform_2, window_bounds = array<i64: 8, 64>}]} {
    %c0 = arith.constant 0 : index
    %c0_0 = arith.constant 0 : index
    %0 = vector.load %arg1[%c0, %c0_0] : memref<8x64xf32, #tpu.memory_space<vmem>>, vector<8x64xf32>
    %c0_1 = arith.constant 0 : index
    %c0_2 = arith.constant 0 : index
    %1 = vector.load %arg2[%c0_1, %c0_2] : memref<8x64xf32, #tpu.memory_space<vmem>>, vector<8x64xf32>
    %2 = arith.addf %0, %1 : vector<8x64xf32>
    %c0_3 = arith.constant 0 : index
    %c0_4 = arith.constant 0 : index
    %3 = vector.load %arg3[%c0_3, %c0_4] : memref<8x64xf32, #tpu.memory_space<vmem>>, vector<8x64xf32>
    tpu.vector_store %arg3[%c0_3, %c0_4], %2 {strides = array<i32>} : memref<8x64xf32, #tpu.memory_space<vmem>>, vector<8x64xf32>,
    return
  }
  func.func @transform_0(%arg0: i32) -> (i32, i32) {
    %c0_i32 = arith.constant 0 : i32
    %c0_i32_0 = arith.constant 0 : i32
    return %arg0, %c0_i32 : i32, i32
  }
  func.func @transform_1(%arg0: i32) -> (i32, i32) {
    %c0_i32 = arith.constant 0 : i32
    %c0_i32_0 = arith.constant 0 : i32
    return %arg0, %c0_i32 : i32, i32
  }
  func.func @transform_2(%arg0: i32) -> (i32, i32) {
    %c0_i32 = arith.constant 0 : i32
    %c0_i32_0 = arith.constant 0 : i32
    return %arg0, %c0_i32 : i32, i32
  }
}

</mosaic_0001>

<bundles_post_ra>
// kernel: tpu_custom_call.1
= control target key start
LH: loop header
LB: loop body
LE: loop exit
PB: predicated region body
PF: predicated region fallthrough
CT: control target
= control target key end

     0   :  { %7 = vsyncpa [#allocation3], 0  ;;  %s196_s0 = inlined_call_operand.hbm [shape: f32[8,64], index: 0, kind: input, shape index: {}, may-alias: {0,2}]   ;;  %s197_s1 = inlined_call_operand.hbm [shape: f32[64,64], index: 1, kind: input, shape index: {}]   ;;  %s198_s2 = inlined_call_operand.hbm [shape: f32[8,64], index: 2, kind: output, shape index: {}, may-alias: {0,2}]  }
   0x1   :  { %8 = vsyncpa [#allocation6], 0 }
   0x2   :  { %9 = vsyncpa [#allocation4], 0  ;;  %s132_s9 = smov [#allocation2]   ;;  %s133_s11 = smov [#allocation5]  }
   0x3   :  { %s16_s10 = sshll.u32 %s132_s9, 4  ;;  %s26_s12 = sshll.u32 %s133_s11, 4  ;;  %s17_s10 = int_to_ptr.vmem [resolvable:$true] %s16_s10  ;;  %s150_s12 = int_to_ptr.vmem [resolvable:$true] %s26_s12 }
   0x4   :  { %s60_s15 = scalar_lea.hbm %s196_s0, 128 }
   0x5   :  { %p61_p0 = scmp.ne.s32.totalorder %s196_s0, %s60_s15  ;;  %p64_p1 = scmp.lt.u32.totalorder %s60_s15, %s196_s0 }
   0x7   :  { %p66_p2 = pnand %p64_p1, %p61_p0 }
   0x9   :  { %69 = shalt.err (!%p66_p2)
}
   0xa   :  { %s70_s20 = scalar_lea.vmem %s17_s10, 128  ;;  %p75_p4 = scmp.lt.s32.totalorder %s17_s10, %s17_s10 }
   0xb   :  { %p71_p3 = scmp.ne.s32.totalorder %s17_s10, %s70_s20  ;;  %p76_p5 = scmp.lt.s32.totalorder %s70_s20, %s70_s20 }
   0xd   :  { %p77_p6 = por %p76_p5, %p75_p4 }
   0xf   :  { %p78_p7 = pnand %p77_p6, %p71_p3 }
  0x11   :  { %81 = shalt.err (!%p78_p7)
}
  0x12   :  { %19 = dma.hbm_to_vmem [thread:$0]  %s196_s0, 128, %s17_s10, [#allocation3]  }
  0x13   :  { %s82_s25 = scalar_lea.hbm %s197_s1, 128  ;;  %s84_s30 = scalar_lea.hbm %s197_s1, 1024 }
  0x14   :  { %p83_p8 = scmp.ne.s32.totalorder %s197_s1, %s82_s25  ;;  %p85_p9 = scmp.lt.u32.totalorder %s84_s30, %s82_s25 }
  0x15   :  { %p86_p10 = scmp.lt.u32.totalorder %s82_s25, %s197_s1 }
  0x17   :  { %p87_p11 = por %p86_p10, %p85_p9 }
  0x19   :  { %p88_p12 = pnand %p87_p11, %p83_p8 }
  0x1b   :  { %91 = shalt.err (!%p88_p12)
}
  0x1c   :  { %s92_s0 = scalar_lea.vmem %s150_s12, 128  ;;  %p97_p0 = scmp.lt.s32.totalorder %s150_s12, %s150_s12 }
  0x1d   :  { %p93_p13 = scmp.ne.s32.totalorder %s150_s12, %s92_s0  ;;  %p98_p1 = scmp.lt.s32.totalorder %s92_s0, %s92_s0 }
  0x1f   :  { %p99_p2 = por %p98_p1, %p97_p0 }
  0x21   :  { %p100_p3 = pnand %p99_p2, %p93_p13 }
  0x23   :  { %103 = shalt.err (!%p100_p3)
}
  0x24   :  { %29 = dma.hbm_to_vmem [thread:$0]  %s197_s1, 128, %s150_s12, [#allocation6]  }
  0x25   :  { %126 = dma.done.wait [#allocation3], 128  }
  0x26   :  { %127 = vsyncadd [#allocation3], 4294967168 }
  0x27   :  { %128 = dma.done.wait [#allocation6], 128  }
  0x28   :  { %129 = vsyncadd [#allocation6], 4294967168  ;;  %s134_s7 = smov [#allocation7]   ;;  %v36_v0 = vld [vmem:[#allocation2] sm:$0xff]  ;;  %v37_v1 = vld [vmem:[#allocation5] sm:$0xff]  ;;  %vm39_vm0 = vcmask 523264  }
  0x29   :  { %s47_s8 = sshll.u32 %s134_s7, 4  ;;  %v38_v2 = vadd.f32 %v37_v1, %v36_v0  ;;  %s48_s8 = int_to_ptr.vmem [resolvable:$true] %s47_s8 }
  0x2a   :  { %s104_s9 = scalar_lea.vmem %s48_s8, 128  ;;  %p109_p5 = scmp.lt.s32.totalorder %s48_s8, %s48_s8 }
  0x2b   :  { %40 = vst.msk [vmem:[#allocation7] sm:$0xff] %vm39_vm0, %v38_v2  ;;  %p105_p4 = scmp.ne.s32.totalorder %s48_s8, %s104_s9  ;;  %p110_p6 = scmp.lt.s32.totalorder %s104_s9, %s104_s9 }
  0x2d   :  { %p111_p7 = por %p110_p6, %p109_p5 }
  0x2f   :  { %p112_p8 = pnand %p111_p7, %p105_p4 }
  0x31   :  { %115 = shalt.err (!%p112_p8)
}
  0x32   :  { %s116_s11 = scalar_lea.hbm %s198_s2, 128 }
  0x33   :  { %p117_p9 = scmp.ne.s32.totalorder %s198_s2, %s116_s11  ;;  %p120_p10 = scmp.lt.u32.totalorder %s116_s11, %s198_s2 }
  0x35   :  { %p122_p11 = pnand %p120_p10, %p117_p9 }
  0x37   :  { %125 = shalt.err (!%p122_p11)
}
  0x38   :  { %50 = dma.vmem_to_hbm [thread:$0]  %s48_s8, 128, %s198_s2, [#allocation4]  }
  0x39   :  { %130 = dma.done.wait [#allocation4], 128  }
  0x3a   :  { %131 = vsyncadd [#allocation4], 4294967168 }
  0x3b   :  { %54 = vsyncpa [#allocation3], 1 }
  0x3c   :  { %55 = vsyncpa [#allocation6], 1 }
  0x3d   :  { %56 = vsyncpa [#allocation4], 1 }

</bundles_post_ra>
